<compile_context>
chip_gen: v5e
topology: v5e:2x2
jax: 0.10.0
libtpu: 0.0.40
codegen_flags: <defaults>
</compile_context>

<pallas_src>
import math

import jax
import jax.numpy as jnp
from jax import lax
from jax.experimental import pallas as pl
from jax.experimental.pallas import tpu as pltpu


def _round_up(x, m):
    return (x + m - 1) // m * m


def _cdiv(a, b):
    return (a + b - 1) // b


def _linear_logsoftmax_kernel(x_ref, w_ref, b_ref, o_ref, m_ref, l_ref):
    p = pl.program_id(1)          # pass: 0 = reduce (max / sum-exp), 1 = write
    j = pl.program_id(2)          # vocab tile index
    nj = pl.num_programs(2)

    # logits tile (tm, tv) = x (tm, d) @ w (tv, d)^T ; transpose handled by the
    # MXU (contract d_model on both operands), f32 accumulation. Bias is f32.
    logits = lax.dot_general(
        x_ref[...], w_ref[...],
        dimension_numbers=(((1,), (1,)), ((), ())),
        preferred_element_type=jnp.float32,
    ) + b_ref[...]

    @pl.when((p == 0) & (j == 0))
    def _():
        m_ref[...] = jnp.full_like(m_ref, -jnp.inf)
        l_ref[...] = jnp.zeros_like(l_ref)

    @pl.when(p == 0)
    def _():
        m_prev = m_ref[...]
        m_new = jnp.maximum(m_prev, jnp.max(logits, axis=-1, keepdims=True))
        # First tile: m_prev == -inf -> exp(-inf) == 0 and l starts at 0 (safe).
        l_ref[...] = l_ref[...] * jnp.exp(m_prev - m_new) + jnp.sum(
            jnp.exp(logits - m_new), axis=-1, keepdims=True)
        m_ref[...] = m_new

    # End of the reduction pass: finalize lse once per row block (hoisted out of
    # pass 1, which then becomes a pure subtract-and-store epilogue).
    @pl.when((p == 0) & (j == nj - 1))
    def _():
        l_ref[...] = m_ref[...] + jnp.log(l_ref[...])

    @pl.when(p == 1)
    def _():
        o_ref[...] = (logits - l_ref[...]).astype(o_ref.dtype)


def linear_log_softmax(x, weight, bias, *, tm=512, tv=512,
                       out_dtype=jnp.float32, compute_dtype=jnp.bfloat16):
    """x: [B, S, d_model], weight: [vocab, d_model] (PyTorch layout), bias: [vocab].

    Returns log_softmax(x @ weight.T + bias, axis=-1) with shape [B, S, vocab].

    compute_dtype: dtype of the matmul operands (default bf16 -- MXU native;
    accumulation and all softmax math stay in f32). Pass jnp.float32 (or None)
    to keep full-precision operands.
    """
    B, S, d_model = x.shape
    vocab, d_model_w = weight.shape
    assert d_model_w == d_model
    M = B * S

    cd = jnp.dtype(compute_dtype) if compute_dtype is not None else jnp.dtype(x.dtype)
    out_itemsize = jnp.dtype(out_dtype).itemsize

    x2 = x.reshape(M, d_model)
    if x2.dtype != cd:
        x2 = x2.astype(cd)
    if weight.dtype != cd:
        weight = weight.astype(cd)
    # Bias (and the -1e30 vocab padding below) must stay f32: cast to bf16 it
    # would become -inf and could poison the normalizer with exp(-inf - -inf).
    b2 = bias.astype(jnp.float32).reshape(1, vocab)

    # ---- tile sizing ---------------------------------------------------------
    row_align = 16 if cd.itemsize < 4 else 8   # bf16 packs 16 rows per vreg
    tm_eff = _round_up(min(tm, _round_up(M, row_align)), row_align)
    tv_eff = _round_up(min(tv, _round_up(vocab, 128)), 128)

    # v7x has 2 TensorCores; the "parallel" row axis shards across them, so make
    # sure there are at least 2 row blocks when M allows it (harmless on v5e/v6e).
    if _cdiv(M, tm_eff) == 1:
        half = _round_up((M + 1) // 2, row_align)
        if half < tm_eff:
            tm_eff = half

    # VMEM budget: derive from the actual chip (64 MiB/core on v7x, 128 MiB on
    # v5e/v6e) and leave headroom for compiler-internal scratch.
    try:
        vmem_cap = int(pltpu.get_tpu_info().vmem_capacity_bytes)
    except Exception:
        vmem_cap = 64 * 1024 * 1024            # conservative: assume v7x
    vmem_budget = min(vmem_cap * 3 // 4, 112 * 1024 * 1024)

    def _footprint(tm_, tv_):
        return (2 * tm_ * d_model * cd.itemsize        # x block (double-buffered)
                + 2 * tv_ * d_model * cd.itemsize      # weight tile
                + 2 * tv_ * 4                          # bias tile
                + 2 * tm_ * tv_ * out_itemsize         # output tile
                + 2 * tm_ * 4)                         # m / l scratch

    min_tm = max(row_align, 64 if M >= 64 else row_align)
    while _footprint(tm_eff, tv_eff) > vmem_budget and tm_eff > min_tm:
        tm_eff = max(min_tm, _round_up(tm_eff // 2, row_align))
    while _footprint(tm_eff, tv_eff) > vmem_budget and tv_eff > 128:
        tv_eff = max(128, _round_up(tv_eff // 2, 128))

    M_pad = _round_up(M, tm_eff)
    V_pad = _round_up(vocab, tv_eff)

    if M_pad != M:
        x2 = jnp.pad(x2, ((0, M_pad - M), (0, 0)))
    if V_pad != vocab:
        # Padded vocab columns get a very negative (f32) bias so they contribute
        # exp(~-1e30) == 0 to the log-softmax normalizer.
        weight = jnp.pad(weight, ((0, V_pad - vocab), (0, 0)))
        b2 = jnp.pad(b2, ((0, 0), (0, V_pad - vocab)), constant_values=-1e30)

    n_row_blocks = M_pad // tm_eff
    n_vocab_blocks = V_pad // tv_eff
    grid = (n_row_blocks, 2, n_vocab_blocks)

    cost = pl.CostEstimate(
        flops=int(2 * 2 * M_pad * V_pad * d_model),              # two matmul passes
        transcendentals=int(M_pad * V_pad),                      # exp in pass 0
        bytes_accessed=int(
            M_pad * d_model * cd.itemsize                        # x, resident per row block
            + 2 * n_row_blocks * V_pad * d_model * cd.itemsize   # weight, 2 passes / row block
            + 2 * n_row_blocks * V_pad * 4                       # bias, 2 passes / row block
            + M_pad * V_pad * out_itemsize),                     # output, written once
    )

    out = pl.pallas_call(
        _linear_logsoftmax_kernel,
        out_shape=jax.ShapeDtypeStruct((M_pad, V_pad), out_dtype),
        grid_spec=pltpu.PrefetchScalarGridSpec(
            num_scalar_prefetch=0,
            grid=grid,
            in_specs=[
                # x row block: constant across (p, j) -> stays resident in VMEM.
                pl.BlockSpec((tm_eff, d_model), lambda i, p, j: (i, 0)),
                # weight tile in [vocab, d_model] layout, tiled on vocab.
                pl.BlockSpec((tv_eff, d_model), lambda i, p, j: (j, 0)),
                # bias tile (f32).
                pl.BlockSpec((1, tv_eff), lambda i, p, j: (0, j)),
            ],
            # During pass 0 the output is parked on block (i, 0) and never
            # written; each block is written exactly once in pass 1 and flushed
            # to HBM exactly once when the block index advances.
            out_specs=pl.BlockSpec((tm_eff, tv_eff), lambda i, p, j: (i, p * j)),
            scratch_shapes=[
                pltpu.VMEM((tm_eff, 1), jnp.float32),   # running max
                pltpu.VMEM((tm_eff, 1), jnp.float32),   # running sum-exp -> lse
            ],
        ),
        compiler_params=pltpu.CompilerParams(
            dimension_semantics=("parallel", "arbitrary", "arbitrary"),
            vmem_limit_bytes=int(vmem_budget),
        ),
        cost_estimate=cost,
    )(x2, weight, b2)

    return out[:M, :vocab].reshape(B, S, vocab)


if __name__ == "__main__":
    key = jax.random.PRNGKey(0)

    def make_inputs(k, B, S, d_model, vocab):
        kx, kw, kb = jax.random.split(k, 3)
        x = jax.random.normal(kx, (B, S, d_model), dtype=jnp.float32)
        bound = 1.0 / math.sqrt(d_model)
        w = jax.random.uniform(kw, (vocab, d_model), minval=-bound, maxval=bound,
                               dtype=jnp.float32)
        b = jax.random.uniform(kb, (vocab,), minval=-bound, maxval=bound,
                               dtype=jnp.float32)
        return x, w, b

    # Case 1: small shapes consistent with the module, f32 compute path
    # (exact math -> tight tolerance, validates the kernel structure).
    B, S, d_model, vocab = 2, 8, 32, 128
    k1, k2 = jax.random.split(key)
    x, w, b = make_inputs(k1, B, S, d_model, vocab)
    out = jax.block_until_ready(
        linear_log_softmax(x, w, b, compute_dtype=jnp.float32))
    ref = jax.nn.log_softmax(x @ w.T + b, axis=-1)
    assert out.shape == (B, S, vocab)
    assert jnp.allclose(out, ref, atol=1e-5, rtol=1e-5), \
        float(jnp.max(jnp.abs(out - ref)))

    # Case 2: default bf16 compute, multi-tile vocab + non-divisible shapes
    # (exercises the online reduction across vocab tiles, row/vocab padding and
    # the >=2-row-block split). Looser tolerance for bf16 matmul operands.
    B2, S2, d2, v2 = 2, 10, 48, 200
    x2_, w2_, b2_ = make_inputs(k2, B2, S2, d2, v2)
    out2 = jax.block_until_ready(linear_log_softmax(x2_, w2_, b2_, tv=128))
    ref2 = jax.nn.log_softmax(x2_ @ w2_.T + b2_, axis=-1)
    assert out2.shape == (B2, S2, v2)
    assert bool(jnp.all(jnp.isfinite(out2)))
    assert jnp.allclose(out2, ref2, atol=3e-2, rtol=0.0), \
        float(jnp.max(jnp.abs(out2 - ref2)))

    print("KERNEL_OK")
</pallas_src>

<mosaic_0001>
module attributes {stable_mosaic.version = 11 : i64} {
  func.func @_linear_logsoftmax_kernel(%arg0: i32, %arg1: i32, %arg2: i32, %arg3: memref<8x32xf32, #tpu.memory_space<vmem>>, %arg4: memref<128x32xf32, #tpu.memory_space<vmem>>, %arg5: memref<1x128xf32, #tpu.memory_space<vmem>>, %arg6: memref<8x128xf32, #tpu.memory_space<vmem>>, %arg7: memref<8x1xf32, #tpu.memory_space<vmem>>, %arg8: memref<8x1xf32, #tpu.memory_space<vmem>>) attributes {dimension_semantics = [#tpu.dimension_semantics<parallel>, #tpu.dimension_semantics<arbitrary>, #tpu.dimension_semantics<arbitrary>], iteration_bounds = array<i64: 2, 2, 1>, scalar_prefetch = 0 : i64, scratch_operands = 2 : i64, tpu.core_type = #tpu.core_type<tc>, window_params = [{transform_indices = @transform_0, window_bounds = array<i64: 8, 32>}, {transform_indices = @transform_1, window_bounds = array<i64: 128, 32>}, {transform_indices = @transform_2, window_bounds = array<i64: 1, 128>}, {transform_indices = @transform_3, window_bounds = array<i64: 8, 128>}]} {
    %c0 = arith.constant 0 : index
    %c0_0 = arith.constant 0 : index
    %0 = vector.load %arg3[%c0, %c0_0] : memref<8x32xf32, #tpu.memory_space<vmem>>, vector<8x32xf32>
    %c0_1 = arith.constant 0 : index
    %c0_2 = arith.constant 0 : index
    %1 = vector.load %arg4[%c0_1, %c0_2] : memref<128x32xf32, #tpu.memory_space<vmem>>, vector<128x32xf32>
    %cst = arith.constant dense<0.000000e+00> : vector<8x128xf32>
    %2 = tpu.matmul %0, %1, %cst {dimension_numbers = #tpu.dot_dimension_numbers<[1], [1], [0], [0], [0, 0, 1, 0], [], []>} : vector<8x32xf32>, vector<128x32xf32>, vector<8x128xf32> -> vector<8x128xf32>
    %c0_3 = arith.constant 0 : index
    %c0_4 = arith.constant 0 : index
    %3 = vector.load %arg5[%c0_3, %c0_4] : memref<1x128xf32, #tpu.memory_space<vmem>>, vector<1x128xf32>
    %4 = vector.broadcast %3 : vector<1x128xf32> to vector<8x128xf32>
    %5 = arith.addf %2, %4 : vector<8x128xf32>
    %c0_i32 = arith.constant 0 : i32
    %6 = arith.cmpi eq, %arg1, %c0_i32 : i32
    %c0_i32_5 = arith.constant 0 : i32
    %7 = arith.cmpi eq, %arg2, %c0_i32_5 : i32
    %8 = arith.andi %6, %7 : i1
    %9 = arith.extui %8 : i1 to i32
    %c0_i32_6 = arith.constant 0 : i32
    %10 = arith.cmpi ne, %9, %c0_i32_6 : i32
    scf.if %10 {
      %cst_13 = arith.constant 0xFF800000 : f32
      %22 = vector.broadcast %cst_13 : f32 to vector<8x1xf32>
      %c0_14 = arith.constant 0 : index
      %c0_15 = arith.constant 0 : index
      %23 = vector.load %arg7[%c0_14, %c0_15] : memref<8x1xf32, #tpu.memory_space<vmem>>, vector<8x1xf32>
      tpu.vector_store %arg7[%c0_14, %c0_15], %22 {strides = array<i32>} : memref<8x1xf32, #tpu.memory_space<vmem>>, vector<8x1xf32>,
      %cst_16 = arith.constant 0.000000e+00 : f32
      %24 = vector.broadcast %cst_16 : f32 to vector<8x1xf32>
      %c0_17 = arith.constant 0 : index
      %c0_18 = arith.constant 0 : index
      %25 = vector.load %arg8[%c0_17, %c0_18] : memref<8x1xf32, #tpu.memory_space<vmem>>, vector<8x1xf32>
      tpu.vector_store %arg8[%c0_17, %c0_18], %24 {strides = array<i32>} : memref<8x1xf32, #tpu.memory_space<vmem>>, vector<8x1xf32>,
    } else {
    }
    %c0_i32_7 = arith.constant 0 : i32
    %11 = arith.cmpi eq, %arg1, %c0_i32_7 : i32
    %12 = arith.extui %11 : i1 to i32
    %c0_i32_8 = arith.constant 0 : i32
    %13 = arith.cmpi ne, %12, %c0_i32_8 : i32
    scf.if %13 {
      %c0_13 = arith.constant 0 : index
      %c0_14 = arith.constant 0 : index
      %22 = vector.load %arg7[%c0_13, %c0_14] : memref<8x1xf32, #tpu.memory_space<vmem>>, vector<8x1xf32>
      %cst_15 = arith.constant dense<0xFF800000> : vector<8xf32>
      %23 = vector.multi_reduction <maximumf>, %5, %cst_15 [1] : vector<8x128xf32> to vector<8xf32>
      %24 = vector.shape_cast %23 : vector<8xf32> to vector<8x1xf32>
      %25 = arith.maximumf %22, %24 : vector<8x1xf32>
      %c0_16 = arith.constant 0 : index
      %c0_17 = arith.constant 0 : index
      %26 = vector.load %arg8[%c0_16, %c0_17] : memref<8x1xf32, #tpu.memory_space<vmem>>, vector<8x1xf32>
      %27 = arith.subf %22, %25 : vector<8x1xf32>
      %28 = math.exp %27 : vector<8x1xf32>
      %29 = arith.mulf %26, %28 : vector<8x1xf32>
      %30 = vector.broadcast %25 : vector<8x1xf32> to vector<8x128xf32>
      %31 = arith.subf %5, %30 : vector<8x128xf32>
      %32 = math.exp %31 : vector<8x128xf32>
      %cst_18 = arith.constant dense<0.000000e+00> : vector<8xf32>
      %33 = vector.multi_reduction <add>, %32, %cst_18 [1] : vector<8x128xf32> to vector<8xf32>
      %34 = vector.shape_cast %33 : vector<8xf32> to vector<8x1xf32>
      %35 = arith.addf %29, %34 : vector<8x1xf32>
      %c0_19 = arith.constant 0 : index
      %c0_20 = arith.constant 0 : index
      %36 = vector.load %arg8[%c0_19, %c0_20] : memref<8x1xf32, #tpu.memory_space<vmem>>, vector<8x1xf32>
      tpu.vector_store %arg8[%c0_19, %c0_20], %35 {strides = array<i32>} : memref<8x1xf32, #tpu.memory_space<vmem>>, vector<8x1xf32>,
      %c0_21 = arith.constant 0 : index
      %c0_22 = arith.constant 0 : index
      %37 = vector.load %arg7[%c0_21, %c0_22] : memref<8x1xf32, #tpu.memory_space<vmem>>, vector<8x1xf32>
      tpu.vector_store %arg7[%c0_21, %c0_22], %25 {strides = array<i32>} : memref<8x1xf32, #tpu.memory_space<vmem>>, vector<8x1xf32>,
    } else {
    }
    %c0_i32_9 = arith.constant 0 : i32
    %14 = arith.cmpi eq, %arg1, %c0_i32_9 : i32
    %c0_i32_10 = arith.constant 0 : i32
    %15 = arith.cmpi eq, %arg2, %c0_i32_10 : i32
    %16 = arith.andi %14, %15 : i1
    %17 = arith.extui %16 : i1 to i32
    %c0_i32_11 = arith.constant 0 : i32
    %18 = arith.cmpi ne, %17, %c0_i32_11 : i32
    scf.if %18 {
      %c0_13 = arith.constant 0 : index
      %c0_14 = arith.constant 0 : index
      %22 = vector.load %arg7[%c0_13, %c0_14] : memref<8x1xf32, #tpu.memory_space<vmem>>, vector<8x1xf32>
      %c0_15 = arith.constant 0 : index
      %c0_16 = arith.constant 0 : index
      %23 = vector.load %arg8[%c0_15, %c0_16] : memref<8x1xf32, #tpu.memory_space<vmem>>, vector<8x1xf32>
      %24 = math.log %23 : vector<8x1xf32>
      %25 = arith.addf %22, %24 : vector<8x1xf32>
      %c0_17 = arith.constant 0 : index
      %c0_18 = arith.constant 0 : index
      %26 = vector.load %arg8[%c0_17, %c0_18] : memref<8x1xf32, #tpu.memory_space<vmem>>, vector<8x1xf32>
      tpu.vector_store %arg8[%c0_17, %c0_18], %25 {strides = array<i32>} : memref<8x1xf32, #tpu.memory_space<vmem>>, vector<8x1xf32>,
    } else {
    }
    %c1_i32 = arith.constant 1 : i32
    %19 = arith.cmpi eq, %arg1, %c1_i32 : i32
    %20 = arith.extui %19 : i1 to i32
    %c0_i32_12 = arith.constant 0 : i32
    %21 = arith.cmpi ne, %20, %c0_i32_12 : i32
    scf.if %21 {
      %c0_13 = arith.constant 0 : index
      %c0_14 = arith.constant 0 : index
      %22 = vector.load %arg8[%c0_13, %c0_14] : memref<8x1xf32, #tpu.memory_space<vmem>>, vector<8x1xf32>
      %23 = vector.broadcast %22 : vector<8x1xf32> to vector<8x128xf32>
      %24 = arith.subf %5, %23 : vector<8x128xf32>
      %c0_15 = arith.constant 0 : index
      %c0_16 = arith.constant 0 : index
      %25 = vector.load %arg6[%c0_15, %c0_16] : memref<8x128xf32, #tpu.memory_space<vmem>>, vector<8x128xf32>
      tpu.vector_store %arg6[%c0_15, %c0_16], %24 {strides = array<i32>} : memref<8x128xf32, #tpu.memory_space<vmem>>, vector<8x128xf32>,
    } else {
    }
    return
  }
  func.func @transform_0(%arg0: i32, %arg1: i32, %arg2: i32) -> (i32, i32) {
    %c0_i32 = arith.constant 0 : i32
    %c0_i32_0 = arith.constant 0 : i32
    return %arg0, %c0_i32 : i32, i32
  }
  func.func @transform_1(%arg0: i32, %arg1: i32, %arg2: i32) -> (i32, i32) {
    %c0_i32 = arith.constant 0 : i32
    %c0_i32_0 = arith.constant 0 : i32
    return %arg2, %c0_i32 : i32, i32
  }
  func.func @transform_2(%arg0: i32, %arg1: i32, %arg2: i32) -> (i32, i32) {
    %c0_i32 = arith.constant 0 : i32
    %c0_i32_0 = arith.constant 0 : i32
    return %c0_i32, %arg2 : i32, i32
  }
  func.func @transform_3(%arg0: i32, %arg1: i32, %arg2: i32) -> (i32, i32) {
    %0 = arith.muli %arg1, %arg2 : i32
    %c0_i32 = arith.constant 0 : i32
    return %arg0, %0 : i32, i32
  }
}

</mosaic_0001>

<bundles_post_ra>
// kernel: tpu_custom_call.1
= control target key start
LH: loop header
LB: loop body
LE: loop exit
PB: predicated region body
PF: predicated region fallthrough
CT: control target
= control target key end

     0   :  { %8 = vsyncpa [#allocation5], 0  ;;  %s937_s0 = inlined_call_operand.vmem [shape: f32[16,32], index: 0, kind: input, shape index: {}]   ;;  %s938_s1 = inlined_call_operand.vmem [shape: f32[128,32], index: 1, kind: input, shape index: {}]   ;;  %s939_s2 = inlined_call_operand.vmem [shape: f32[1,128], index: 2, kind: input, shape index: {}]   ;;  %s940_s3 = inlined_call_operand.hbm [shape: f32[16,128], index: 3, kind: output, shape index: {}]  }
   0x1   :  { %10 = vsyncpa [#allocation5 + $0x1], 0  ;;  %s732_s12 = smov 0   ;;  %s734_s13 = smov 0  }
   0x2   :  { %s736_s14 = smov 0   ;;  %s738_s15 = smov 0  }
   0x3   :  { %s740_s16 = smov 0   ;;  %s742_s17 = smov 0  }
   0x4   :  { %s744_s18 = smov 0   ;;  %s746_s19 = smov 0  }
   0x5 LB: > { %s494_s20 = sadd.s32 4294967295, %s706_s19   ;;  %s495_s21 = sadd.s32 4294967294, %s706_s19   ;;  %s706_s19 = sphi %s746_s19, %s16_s19   ;;  %s702_s18 = sphi %s744_s18, %s949_s18   ;;  %s698_s17 = sphi %s742_s17, %s948_s17   ;;  %s694_s16 = sphi %s740_s16, %s947_s16   ;;  %s690_s15 = sphi %s738_s15, %s946_s15   ;;  %s686_s14 = sphi %s736_s14, %s945_s14   ;;  %s682_s13 = sphi %s734_s13, %s944_s13   ;;  %s678_s12 = sphi %s732_s12, %s943_s12  }
   0x6   : > { %s31_s22 = sadd.s32 1, %s698_s17  ;;  %s35_s23 = sadd.s32 1, %s702_s18 }
   0x7   : > { %p33_p0 = scmp.ge.s32.totalorder %s31_s22, 2  ;;  %p134_p1 = scmp.ne.s32.totalorder %s686_s14, %s682_s13 }
   0x8   : > { %p135_p2 = scmp.eq.s32.totalorder %s494_s20, 3  ;;  %p140_p4 = scmp.ne.s32.totalorder %s682_s13, %s678_s12 }
   0x9   : > { %s951_s22 = smov (%p33_p0, %s31_s22), 0  ;;  %s953_s23 = smov (!%p33_p0, %s35_s23), %s702_s18 }
   0xa   : > { %p781_p3 = por %p135_p2, %p134_p1  ;;  %p37_p5 = scmp.ge.s32.totalorder %s953_s23, 2 }
   0xb   : > { %p141_p6 = scmp.eq.s32.totalorder %s495_s21, 3  ;;  %p500_p7 = scmp.ge.s32.totalorder %s706_s19, 1 }
   0xc   : > { %p181_p8 = scmp.lt.s32.totalorder %s706_s19, 5  ;;  %s955_s23 = smov (%p37_p5, %s953_s23), 0 }
   0xd   : > { %p791_p9 = por %p141_p6, %p140_p4  ;;  %s119_s26 = ssub.s32 %s702_s18, %s955_s23 }
   0xe   : > { %p182_p10 = pnand %p500_p7, %p181_p8  ;;  %s124_s27 = sadd.s32 1, %s686_s14 }
   0xf   : > { %p122_p11 = scmp.eq.s32.totalorder %s119_s26, 0  ;;  %s209_s29 = sand.u32 (!%p182_p10), 1, %s682_s13  }
  0x10   : > { %185 = sbr.rel (%p182_p10) target bundleno = 743 (0x2e7), region = 32  ;;  %s807_s5 = sshll.u32 (!%p182_p10), %s209_s29, 3 }
  0x11   : > { %s799_s28 = scalar_select %p122_p11, %s686_s14, %s124_s27  }
  0x12   : > { %p212_p12 = scmp.lt.s32.totalorder (!%p182_p10), %s694_s16, 1  ;;  %p319_p13 = scmp.eq.s32.totalorder (!%p182_p10), %s690_s15, 0 }
  0x13   : > { %s211_s7 = scalar_lea.vmem (!%p182_p10), [#allocation4], %s807_s5 }
  0x15   : > { %v242_v0 = vld [vmem:[%s938_s1 + $0x78] sm:$0xff]  ;;  %vm247_vm0 = vcmask 261120   ;;  %v241_v1 = vld [vmem:[%s938_s1 + $0x70] sm:$0xff]  ;;  %v240_v2 = vld [vmem:[%s938_s1 + $0x68] sm:$0xff]  ;;  %s213_s8 = scalar_select %p212_p12, %s694_s16, 1  ;;  %vm325_vm1 = vcmask (%p319_p13), 7168  }
  0x16   : > { %503 = vmatpush.xpose.msk.msra.mxu0 %vm247_vm0, %v242_v0  ;;  %v239_v3 = vld [vmem:[%s938_s1 + $0x60] sm:$0xff]  ;;  %v238_v4 = vld [vmem:[%s938_s1 + $0x58] sm:$0xff]  ;;  %v237_v5 = vld [vmem:[%s938_s1 + $0x50] sm:$0xff]  ;;  %v708_v20 = vmov (%p319_p13), -inf   ;;  %v709_v21 = vmov (%p319_p13), 0.0  }
  0x17   : > { %v236_v6 = vld [vmem:[%s938_s1 + $0x48] sm:$0xff]  ;;  %v235_v7 = vld [vmem:[%s938_s1 + $0x40] sm:$0xff]  ;;  %v234_v8 = vld [vmem:[%s938_s1 + $0x38] sm:$0xff]  ;;  %s502_s11 = sshll.u32 %s213_s8, 3  ;;  %326 = vst.msk [vmem:[#allocation2] sm:$0xff] (%p319_p13), %vm325_vm1, %v708_v20 }
  0x18   : > { %v233_v9 = vld [vmem:[%s938_s1 + $0x30] sm:$0xff]  ;;  %v232_v10 = vld [vmem:[%s938_s1 + $0x28] sm:$0xff]  ;;  %v231_v11 = vld [vmem:[%s938_s1 + $0x20] sm:$0xff]  ;;  %s215_s30 = scalar_lea.vmem %s937_s0, %s502_s11  ;;  %327 = vst.msk [vmem:[#allocation3] sm:$0xff] (%p319_p13), %vm325_vm1, %v709_v21 }
  0x19   : > { %v230_v12 = vld [vmem:[%s938_s1 + $0x18] sm:$0xff]  ;;  %v229_v13 = vld [vmem:[%s938_s1 + $0x10] sm:$0xff]  ;;  %v228_v14 = vld [vmem:[%s938_s1 + $0x8] sm:$0xff] }
  0x1a   : > { %504 = vmatpush.xpose.msk.msra.mxu0 %vm247_vm0, %v241_v1  ;;  %v227_v15 = vld [vmem:[%s938_s1] sm:$0xff] }
  0x1b   : > { %v226_v16 = vld [vmem:[%s215_s30] sm:$0xff] }
  0x1c   : > { %v603_v17 = vld [vmem:[%s939_s2] ss:$0 sm:$0xff] }
  0x1e   : > { %505 = vmatpush.xpose.msk.msra.mxu0 %vm247_vm0, %v240_v2 }
  0x22   : > { %506 = vmatpush.xpose.msk.msra.mxu0 %vm247_vm0, %v239_v3 }
  0x26   : > { %507 = vmatpush.xpose.msk.msra.mxu0 %vm247_vm0, %v238_v4 }
  0x2a   : > { %508 = vmatpush.xpose.msk.msra.mxu0 %vm247_vm0, %v237_v5 }
  0x2e   : > { %509 = vmatpush.xpose.msk.msra.mxu0 %vm247_vm0, %v236_v6 }
  0x32   : > { %510 = vmatpush.xpose.msk.msra.mxu0 %vm247_vm0, %v235_v7 }
  0x36   : > { %511 = vmatpush.xpose.msk.msra.mxu0 %vm247_vm0, %v234_v8 }
  0x3a   : > { %512 = vmatpush.xpose.msk.msra.mxu0 %vm247_vm0, %v233_v9 }
  0x3e   : > { %513 = vmatpush.xpose.msk.msra.mxu0 %vm247_vm0, %v232_v10 }
  0x42   : > { %514 = vmatpush.xpose.msk.msra.mxu0 %vm247_vm0, %v231_v11 }
  0x46   : > { %515 = vmatpush.xpose.msk.msra.mxu0 %vm247_vm0, %v230_v12 }
  0x4a   : > { %516 = vmatpush.xpose.msk.msra.mxu0 %vm247_vm0, %v229_v13 }
  0x4e   : > { %517 = vmatpush.xpose.msk.msra.mxu0 %vm247_vm0, %v228_v14 }
  0x52   : > { %518 = vmatpush.xpose.msk.msra.mxu0 %vm247_vm0, %v227_v15 }
  0x55   : > { %519 = vmatmul.msk.f32.vlgmr.msra.gmra.mxu0 %vm247_vm0, %v226_v16 }
  0xcf   : > { %324 = sbr.rel (!%p319_p13) target bundleno = 212 (0xd4), region = 36 }
  0xd2   : > { %v316_v18 = vpop.f32.mrf.mxu0 }
  0xd3   : > { %v317_v19 = vadd.f32 %v603_v17, %v316_v18 }
  0xd4 PF: > { %p521_p0 = scmp.ne.s32.totalorder %s690_s15, 0 }
  0xd6   : > { %330 = sbr.rel (%p521_p0) target bundleno = 582 (0x246), region = 40 }
  0xdb   : > { %332 = vmax.xlane.f32.xlu0 %v317_v19  ;;  %v710_v22 = vmov 0   ;;  %v331_v23 = vld [vmem:[#allocation2] sm:$0xff]  ;;  %vm351_vm2 = vcmask 7168   ;;  %v335_v33 = vld [vmem:[#allocation3] sm:$0xff] }
  0xdc   : > { %604 = vset.pattern.permute.xlu0 %v710_v22 }
 0x14e   : > { %v333_v24 = vpop.xlane.xlu0 %332 }
 0x14f   : > { %v334_v25 = vmax.f32 %v331_v23, %v333_v24 }
 0x151   : > { %v336_v26 = vsub.f32 %v331_v23, %v334_v25  ;;  %353 = vst.msk [vmem:[#allocation2] sm:$0xff] %vm351_vm2, %v334_v25  ;;  %342 = vperm.xlu0 %604, %v334_v25  }
 0x153   : > { %v337_v31 = vmul.f32 1.442695, %v336_v26 }
 0x1c3   : > { %v343_v27 = vpop.permute.xlu0 %342 }
 0x1c4   : > { %v345_v28 = vsub.f32 %v317_v19, %v343_v27 }
 0x1c6   : > { %v346_v29 = vmul.f32 1.442695, %v345_v28 }
 0x1c8   : > { %605 = vpow2.f32 %v346_v29 }
 0x1c9   : > { %607 = vpow2.f32 %v337_v31 }
 0x1ce   : > { %v606_v30 = vpop.eup %605 }
 0x1cf   : > { %348 = vadd.xlane.f32.xlu1 %v606_v30  ;;  %v608_v32 = vpop.eup %607 }
 0x1d0   : > { %v339_v34 = vmul.f32 %v608_v32, %v335_v33 }
 0x242   : > { %v349_v35 = vpop.xlane.xlu1 %348 }
 0x243   : > { %v350_v36 = vadd.f32 %v349_v35, %v339_v34 }
 0x245   : > { %352 = vst.msk [vmem:[#allocation3] sm:$0xff] %vm351_vm2, %v350_v36 }
 0x246 PF: > { %355 = sbr.rel (!%p319_p13) target bundleno = 601 (0x259), region = 44  ;;  %v356_v39 = vld [vmem:[#allocation2] sm:$0xff] (%p319_p13)  ;;  %vm361_vm3 = vcmask (%p319_p13), 7168  }
 0x24c   : > { %v357_v37 = vld [vmem:[#allocation3] sm:$0xff] }
 0x24d   : > { %609 = vlog2.f32 %v357_v37 }
 0x253   : > { %v610_v38 = vpop.eup %609 }
 0x254   : > { %v359_v40 = vmul.f32 0.6931472, %v610_v38 }
 0x256   : > { %v360_v41 = vadd.f32 %v359_v40, %v356_v39 }
 0x258   : > { %362 = vst.msk [vmem:[#allocation3] sm:$0xff] %vm361_vm3, %v360_v41 }
 0x259 PF: > { %p522_p1 = scmp.ne.s32.totalorder %s690_s15, 1 }
 0x25b   : > { %366 = sbr.rel (%p522_p1) target bundleno = 728 (0x2d8), region = 48 }
 0x260   : > { %v367_v42 = vld [vmem:[#allocation3] sm:$0xff]  ;;  %v711_v43 = vmov 0  }
 0x261   : > { %611 = vset.pattern.permute.xlu0 %v711_v43 }
 0x262   : > { %370 = vperm.xlu0 %611, %v367_v42  }
 0x2d4   : > { %v371_v44 = vpop.permute.xlu0 %370 }
 0x2d5   : > { %v373_v45 = vsub.f32 %v317_v19, %v371_v44 }
 0x2d7   : > { %374 = vst [vmem:[%s211_s7] sm:$0xff] %v373_v45 }
 0x2d8 PF: > { %s524_s8 = sshll.u32 %s694_s16, 3  ;;  %s390_s11 = sshll.u32 %s211_s7, 4  ;;  %s391_s11 = int_to_ptr.vmem [resolvable:$true] %s390_s11 }
 0x2d9   : > { %s388_s15 = scalar_lea.hbm %s940_s3, %s524_s8  ;;  %s376_s21 = scalar_lea.sflag [#allocation5], %s209_s29 }
 0x2da   : > { %s392_s20 = sshll.u32 %s388_s15, 4  ;;  %s632_s4 = scalar_lea.hbm %s940_s3, 16  ;;  %s393_s20 = int_to_ptr.hbm [resolvable:$true] %s392_s20 }
 0x2db   : > { %s626_s26 = sshra.s32 %s393_s20, 4  ;;  %s627_s26 = int_to_ptr.hbm [resolvable:$true] %s626_s26 }
 0x2dc   : > { %s628_s27 = scalar_lea.hbm %s627_s26, 8  ;;  %p633_p6 = scmp.lt.s32.totalorder %s627_s26, %s940_s3 }
 0x2dd   : > { %p629_p2 = scmp.ne.s32.totalorder %s627_s26, %s628_s27  ;;  %p634_p7 = scmp.lt.s32.totalorder %s632_s4, %s628_s27 }
 0x2df   : > { %p630_p4 = pnand %p629_p2, %p781_p3  ;;  %p635_p8 = por %p634_p7, %p633_p6 }
 0x2e1   : > { %p631_p5 = pneg %p630_p4 }
 0x2e3   : > { %p636_p10 = pnand %p635_p8, %p631_p5 }
 0x2e5   : > { %639 = shalt.err (!%p636_p10)
}
 0x2e6   : > { %528 = dma.vmem_to_hbm [thread:$0]  (%p781_p3), %s391_s11, 128, %s393_s20, %s376_s21  }
 0x2e7 PF: > { %p534_p11 = scmp.ge.s32.totalorder %s706_s19, 2  ;;  %s404_s29 = sand.u32 1, %s678_s12  }
 0x2e8   : > { %s405_s5 = scalar_lea.sflag [#allocation5], %s404_s29 }
 0x2e9   : > { %p531_p12 = pnand %p534_p11, %p791_p9 }
 0x2eb   : > { %p532_p13 = pneg %p531_p12 }
 0x2ed   : > { %673 = dma.done.wait (%p532_p13), %s405_s5, 128  }
 0x2ee   : > { %675 = vsyncadd (%p532_p13), %s405_s5, 4294967168  ;;  %s16_s19 = sadd.s32 1, %s706_s19   ;;  %s943_s12 = smov %s682_s13 }
 0x2ef   : > { %p13_p0 = scmp.ge.s32.totalorder %s16_s19, 6   ;;  %s944_s13 = smov %s686_s14 }
 0x2f0   : > { %s945_s14 = smov %s799_s28  ;;  %s946_s15 = smov %s698_s17 }
 0x2f1   : > { %s947_s16 = smov %s702_s18  ;;  %s948_s17 = smov %s951_s22 }
 0x2f2   : > { %s949_s18 = smov %s955_s23  ;;  %15 = sbr.rel (!%p13_p0) target bundleno = 5 (0x5), region = 89 }
 0x2f7   :  { %411 = vsyncpa [#allocation5], 1 }
 0x2f8   :  { %413 = vsyncpa [#allocation5 + $0x1], 1 }

</bundles_post_ra>
